<compile_context>
chip_gen: v7x
topology: tpu7x:2x2x1
jax: 0.10.0
libtpu: 0.0.40
codegen_flags: <defaults>
</compile_context>

<pallas_src>
import functools

import jax
import jax.numpy as jnp
from jax.experimental import pallas as pl
from jax.experimental.pallas import tpu as pltpu


def _round_up(x, m):
    return ((x + m - 1) // m) * m


def _mean_pool_kernel(emb_ref, mask_ref, out_ref, acc_ref, cnt_ref, *,
                      seq_len, block_s):
    # emb_ref:  (TB, TS, H)  VMEM tile, caller dtype (f32 / bf16)
    # mask_ref: (TB, TS)     VMEM tile, original (integer/bool) dtype
    # out_ref:  (TB, H)      output tile
    # acc_ref:  (TB, H)      f32 scratch: running masked sum of embeddings
    # cnt_ref:  (TB, 1)      f32 scratch: running sum of the mask
    si = pl.program_id(1)

    @pl.when(si == 0)
    def _init():
        acc_ref[...] = jnp.zeros_like(acc_ref)
        cnt_ref[...] = jnp.zeros_like(cnt_ref)

    mask = mask_ref[...].astype(jnp.float32)          # (TB, TS), in-kernel cast
    emb = emb_ref[...]                                # (TB, TS, H), caller dtype

    if seq_len % block_s != 0:
        # Last S block is ragged: zero both mask and embeddings past seq_len so
        # undefined out-of-bounds data cannot contaminate the accumulator.
        pos = si * block_s + jax.lax.broadcasted_iota(jnp.int32, mask.shape, 1)
        valid = pos < seq_len
        mask = jnp.where(valid, mask, jnp.float32(0.0))
        emb = jnp.where(valid[:, :, None], emb, jnp.zeros_like(emb))

    # Masked partial sum over this S chunk: VPU multiply + cross-sublane reduce.
    acc_ref[...] += jnp.sum(emb.astype(jnp.float32) * mask[:, :, None], axis=1)
    cnt_ref[...] += jnp.sum(mask, axis=1, keepdims=True)

    @pl.when(si == pl.num_programs(1) - 1)
    def _finalize():
        denom = jnp.maximum(cnt_ref[...], jnp.float32(1e-9))   # clamp(min=1e-9)
        out_ref[...] = (acc_ref[...] / denom).astype(out_ref.dtype)


@functools.partial(jax.jit, static_argnames=("block_b", "block_s", "out_dtype"))
def mean_pooling(last_hidden_state, attention_mask, block_b=None, block_s=None,
                 out_dtype=jnp.float32):
    """Pallas equivalent of MeanPooling.forward(model_output, attention_mask).

    last_hidden_state: [B, S, H] float32 or bfloat16
    attention_mask:    [B, S]    any numeric/bool dtype (cast to f32 in-kernel)
    returns:           [B, H]    out_dtype (default float32, matching torch)
    """
    B, S, H = last_hidden_state.shape
    assert attention_mask.shape == (B, S)
    emb_isz = jnp.dtype(last_hidden_state.dtype).itemsize
    mask_isz = jnp.dtype(attention_mask.dtype).itemsize
    out_isz = jnp.dtype(out_dtype).itemsize

    # ------------------------------------------------------------------
    # Generation-aware VMEM budgets (trace-time hardware query).
    # ------------------------------------------------------------------
    try:
        vmem_cap = int(pltpu.get_tpu_info().vmem_capacity_bytes)
    except Exception:
        vmem_cap = 64 << 20  # conservative fallback (v7x-class)
    if vmem_cap <= (64 << 20):            # v7x-class: 64 MiB VMEM per TC
        work_budget = 32 << 20            # per-step working set (DMA + f32 temps)
        vmem_limit_cap = 48 << 20         # leave headroom under 64 MiB
    else:                                  # v5e / v6e: 128 MiB VMEM
        work_budget = 80 << 20
        vmem_limit_cap = 96 << 20

    # Per tile element: double-buffered DMA bytes + two f32 in-kernel temps
    # (widened chunk + masked product).  Budget the tile so the whole per-step
    # working set stays inside `work_budget`.
    per_elem_bytes = 2 * emb_isz + 8
    elem_budget = max(work_budget // per_elem_bytes, 8 * 8)

    # ------------------------------------------------------------------
    # Pick batch tile (TB) and sequence tile (TS).
    # TB: equal to B when B <= 8 (legal "full dim" block), otherwise a
    # multiple of 8 sized purely from the byte budget (no 64-row cap).
    # TS: full S if it fits, otherwise a multiple of 8 (ragged tail handled
    # in-kernel), so no wrapper-side padding / extra HBM traffic is needed.
    # ------------------------------------------------------------------
    if block_b is None or block_s is None:
        row_elems = S * H
        if B <= 8:
            tb = B
        else:
            tb_budget = (elem_budget // max(row_elems, 1) // 8) * 8
            tb = max(8, min(_round_up(B, 8), tb_budget))
        if tb * row_elems <= elem_budget:
            ts = S
        else:
            ts = (elem_budget // max(tb * H, 1) // 8) * 8
            ts = min(S, max(8, ts))
        if block_b is None:
            block_b = tb
        if block_s is None:
            block_s = ts

    grid = (pl.cdiv(B, block_b), pl.cdiv(S, block_s))

    # ------------------------------------------------------------------
    # Scoped VMEM limit: double-buffered input/output tiles + scratch + the
    # in-kernel f32 chunk temporaries (previously uncounted) + slack.
    # ------------------------------------------------------------------
    emb_tile = block_b * block_s * H * emb_isz
    mask_tile = block_b * block_s * mask_isz
    out_tile = block_b * H * out_isz
    scratch_bytes = block_b * H * 4 + block_b * 128 * 4
    temp_bytes = 2 * block_b * block_s * H * 4
    vmem_limit = (2 * (emb_tile + mask_tile) + 2 * out_tile
                  + scratch_bytes + temp_bytes + (4 << 20))
    vmem_limit = int(min(max(vmem_limit, 16 << 20), vmem_limit_cap))

    kernel = functools.partial(_mean_pool_kernel, seq_len=S, block_s=block_s)

    out = pl.pallas_call(
        kernel,
        out_shape=jax.ShapeDtypeStruct((B, H), out_dtype),
        grid_spec=pltpu.PrefetchScalarGridSpec(
            num_scalar_prefetch=0,
            grid=grid,
            in_specs=[
                pl.BlockSpec((block_b, block_s, H), lambda b, s: (b, s, 0)),
                pl.BlockSpec((block_b, block_s), lambda b, s: (b, s)),
            ],
            out_specs=pl.BlockSpec((block_b, H), lambda b, s: (b, 0)),
            scratch_shapes=[
                pltpu.VMEM((block_b, H), jnp.float32),   # running masked sum
                pltpu.VMEM((block_b, 1), jnp.float32),   # running mask count
            ],
        ),
        compiler_params=pltpu.CompilerParams(
            dimension_semantics=("parallel", "arbitrary"),
            vmem_limit_bytes=vmem_limit,
        ),
    )(last_hidden_state, attention_mask)

    return out


def _reference(last_hidden_state, attention_mask):
    mask = attention_mask.astype(jnp.float32)[..., None]             # [B, S, 1]
    sum_emb = jnp.sum(last_hidden_state.astype(jnp.float32) * mask, axis=1)
    sum_mask = jnp.maximum(jnp.sum(mask, axis=1), jnp.float32(1e-9))
    return sum_emb / sum_mask


if __name__ == "__main__":
    key = jax.random.PRNGKey(0)
    k1, k2 = jax.random.split(key)

    B, S, H = 2, 8, 32
    last_hidden_state = jax.random.normal(k1, (B, S, H), dtype=jnp.float32)
    # 0/1 attention mask (like tokenizer output), with some padding positions.
    attention_mask = (jax.random.uniform(k2, (B, S)) > 0.3).astype(jnp.int32)

    out = mean_pooling(last_hidden_state, attention_mask)
    out = jax.block_until_ready(out)

    ref = _reference(last_hidden_state, attention_mask)
    assert out.shape == (B, H)
    # Exact divide in-kernel -> tight tolerance.
    assert jnp.allclose(out, ref, atol=1e-5, rtol=1e-5)

    print("KERNEL_OK")
</pallas_src>

<mosaic_0001>
module attributes {stable_mosaic.version = 11 : i64} {
  func.func @_mean_pool_kernel(%arg0: i32, %arg1: i32, %arg2: memref<2x8x32xf32, #tpu.memory_space<vmem>>, %arg3: memref<2x8xi32, #tpu.memory_space<vmem>>, %arg4: memref<2x32xf32, #tpu.memory_space<vmem>>, %arg5: memref<2x32xf32, #tpu.memory_space<vmem>>, %arg6: memref<2x1xf32, #tpu.memory_space<vmem>>) attributes {dimension_semantics = [#tpu.dimension_semantics<parallel>, #tpu.dimension_semantics<arbitrary>], iteration_bounds = array<i64: 1, 1>, scalar_prefetch = 0 : i64, scratch_operands = 2 : i64, tpu.core_type = #tpu.core_type<tc>, window_params = [{transform_indices = @transform_0, window_bounds = array<i64: 2, 8, 32>}, {transform_indices = @transform_1, window_bounds = array<i64: 2, 8>}, {transform_indices = @transform_2, window_bounds = array<i64: 2, 32>}]} {
    %c0_i32 = arith.constant 0 : i32
    %0 = arith.cmpi eq, %arg1, %c0_i32 : i32
    %1 = arith.extui %0 : i1 to i32
    %c0_i32_0 = arith.constant 0 : i32
    %2 = arith.cmpi ne, %1, %c0_i32_0 : i32
    scf.if %2 {
      %cst_16 = arith.constant 0.000000e+00 : f32
      %21 = vector.broadcast %cst_16 : f32 to vector<2x32xf32>
      %c0_17 = arith.constant 0 : index
      %c0_18 = arith.constant 0 : index
      %22 = vector.load %arg5[%c0_17, %c0_18] : memref<2x32xf32, #tpu.memory_space<vmem>>, vector<2x32xf32>
      tpu.vector_store %arg5[%c0_17, %c0_18], %21 {strides = array<i32>} : memref<2x32xf32, #tpu.memory_space<vmem>>, vector<2x32xf32>,
      %cst_19 = arith.constant 0.000000e+00 : f32
      %23 = vector.broadcast %cst_19 : f32 to vector<2x1xf32>
      %c0_20 = arith.constant 0 : index
      %c0_21 = arith.constant 0 : index
      %24 = vector.load %arg6[%c0_20, %c0_21] : memref<2x1xf32, #tpu.memory_space<vmem>>, vector<2x1xf32>
      tpu.vector_store %arg6[%c0_20, %c0_21], %23 {strides = array<i32>} : memref<2x1xf32, #tpu.memory_space<vmem>>, vector<2x1xf32>,
    } else {
    }
    %c0 = arith.constant 0 : index
    %c0_1 = arith.constant 0 : index
    %3 = vector.load %arg3[%c0, %c0_1] : memref<2x8xi32, #tpu.memory_space<vmem>>, vector<2x8xi32>
    %4 = arith.sitofp %3 : vector<2x8xi32> to vector<2x8xf32>
    %c0_2 = arith.constant 0 : index
    %c0_3 = arith.constant 0 : index
    %c0_4 = arith.constant 0 : index
    %5 = vector.load %arg2[%c0_2, %c0_3, %c0_4] : memref<2x8x32xf32, #tpu.memory_space<vmem>>, vector<2x8x32xf32>
    %c0_5 = arith.constant 0 : index
    %c0_6 = arith.constant 0 : index
    %6 = vector.load %arg5[%c0_5, %c0_6] : memref<2x32xf32, #tpu.memory_space<vmem>>, vector<2x32xf32>
    %7 = vector.shape_cast %4 : vector<2x8xf32> to vector<2x8x1xf32>
    %8 = vector.broadcast %7 : vector<2x8x1xf32> to vector<2x8x32xf32>
    %9 = arith.mulf %5, %8 : vector<2x8x32xf32>
    %cst = arith.constant dense<0.000000e+00> : vector<2x32xf32>
    %10 = vector.multi_reduction <add>, %9, %cst [1] : vector<2x8x32xf32> to vector<2x32xf32>
    %11 = arith.addf %6, %10 : vector<2x32xf32>
    %c0_7 = arith.constant 0 : index
    %c0_8 = arith.constant 0 : index
    %12 = vector.load %arg5[%c0_7, %c0_8] : memref<2x32xf32, #tpu.memory_space<vmem>>, vector<2x32xf32>
    tpu.vector_store %arg5[%c0_7, %c0_8], %11 {strides = array<i32>} : memref<2x32xf32, #tpu.memory_space<vmem>>, vector<2x32xf32>,
    %c0_9 = arith.constant 0 : index
    %c0_10 = arith.constant 0 : index
    %13 = vector.load %arg6[%c0_9, %c0_10] : memref<2x1xf32, #tpu.memory_space<vmem>>, vector<2x1xf32>
    %cst_11 = arith.constant dense<0.000000e+00> : vector<2xf32>
    %14 = vector.multi_reduction <add>, %4, %cst_11 [1] : vector<2x8xf32> to vector<2xf32>
    %15 = vector.shape_cast %14 : vector<2xf32> to vector<2x1xf32>
    %16 = arith.addf %13, %15 : vector<2x1xf32>
    %c0_12 = arith.constant 0 : index
    %c0_13 = arith.constant 0 : index
    %17 = vector.load %arg6[%c0_12, %c0_13] : memref<2x1xf32, #tpu.memory_space<vmem>>, vector<2x1xf32>
    tpu.vector_store %arg6[%c0_12, %c0_13], %16 {strides = array<i32>} : memref<2x1xf32, #tpu.memory_space<vmem>>, vector<2x1xf32>,
    %c0_i32_14 = arith.constant 0 : i32
    %18 = arith.cmpi eq, %arg1, %c0_i32_14 : i32
    %19 = arith.extui %18 : i1 to i32
    %c0_i32_15 = arith.constant 0 : i32
    %20 = arith.cmpi ne, %19, %c0_i32_15 : i32
    scf.if %20 {
      %c0_16 = arith.constant 0 : index
      %c0_17 = arith.constant 0 : index
      %21 = vector.load %arg6[%c0_16, %c0_17] : memref<2x1xf32, #tpu.memory_space<vmem>>, vector<2x1xf32>
      %cst_18 = arith.constant 9.99999971E-10 : f32
      %22 = vector.broadcast %cst_18 : f32 to vector<2x1xf32>
      %23 = arith.maximumf %21, %22 : vector<2x1xf32>
      %c0_19 = arith.constant 0 : index
      %c0_20 = arith.constant 0 : index
      %24 = vector.load %arg5[%c0_19, %c0_20] : memref<2x32xf32, #tpu.memory_space<vmem>>, vector<2x32xf32>
      %25 = vector.broadcast %23 : vector<2x1xf32> to vector<2x32xf32>
      %26 = arith.divf %24, %25 : vector<2x32xf32>
      %c0_21 = arith.constant 0 : index
      %c0_22 = arith.constant 0 : index
      %27 = vector.load %arg4[%c0_21, %c0_22] : memref<2x32xf32, #tpu.memory_space<vmem>>, vector<2x32xf32>
      tpu.vector_store %arg4[%c0_21, %c0_22], %26 {strides = array<i32>} : memref<2x32xf32, #tpu.memory_space<vmem>>, vector<2x32xf32>,
    } else {
    }
    return
  }
  func.func @transform_0(%arg0: i32, %arg1: i32) -> (i32, i32, i32) {
    %c0_i32 = arith.constant 0 : i32
    %c0_i32_0 = arith.constant 0 : i32
    return %arg0, %arg1, %c0_i32 : i32, i32, i32
  }
  func.func @transform_1(%arg0: i32, %arg1: i32) -> (i32, i32) {
    %c0_i32 = arith.constant 0 : i32
    return %arg0, %arg1 : i32, i32
  }
  func.func @transform_2(%arg0: i32, %arg1: i32) -> (i32, i32) {
    %c0_i32 = arith.constant 0 : i32
    %c0_i32_0 = arith.constant 0 : i32
    return %arg0, %c0_i32 : i32, i32
  }
}

</mosaic_0001>

<bundles_post_ra>
// kernel: mean_pooling.1
= control target key start
LH: loop header
LB: loop body
LE: loop exit
PB: predicated region body
PF: predicated region fallthrough
CT: control target
= control target key end

     0   :  { %7 = vsyncpa [#allocation5], 0  ;;  %s226_s0 = inlined_call_operand.hbm [shape: f32[2,8,32], index: 0, kind: input, shape index: {}]   ;;  %s227_s1 = inlined_call_operand.vmem [shape: s32[2,8], index: 1, kind: input, shape index: {}]   ;;  %s228_s2 = inlined_call_operand.hbm [shape: f32[2,32], index: 2, kind: output, shape index: {}]  }
   0x1   :  { %8 = vsyncpa [#allocation6], 0  ;;  %s173_s9 = smov [#allocation4]   ;;  %s125_s13 = scalar_lea.hbm %s226_s0, 256 }
   0x2   :  { %s14_s10 = sshll.u32 %s173_s9, 4  ;;  %p126_p0 = scmp.ne.s32.totalorder %s226_s0, %s125_s13  ;;  %s15_s10 = int_to_ptr.vmem [resolvable:$true] %s14_s10 }
   0x3   :  { %p129_p1 = scmp.lt.u32.totalorder %s125_s13, %s226_s0 }
   0x5   :  { %p131_p2 = pnand %p129_p1, %p126_p0 }
   0x7   :  { %134 = shalt.err (!%p131_p2)
}
   0x8   :  { %s135_s18 = scalar_lea.vmem %s15_s10, 256  ;;  %p140_p4 = scmp.lt.s32.totalorder %s15_s10, %s15_s10 }
   0x9   :  { %p136_p3 = scmp.ne.s32.totalorder %s15_s10, %s135_s18  ;;  %p141_p5 = scmp.lt.s32.totalorder %s135_s18, %s135_s18 }
   0xb   :  { %p142_p6 = por %p141_p5, %p140_p4 }
   0xd   :  { %p143_p7 = pnand %p142_p6, %p136_p3 }
   0xf   :  { %146 = shalt.err (!%p143_p7)
}
  0x10   :  { %s174_s19 = smov 128   ;;  %s175_s20 = smov 8  }
  0x11   :  { %20 = dma.hbm_to_vmem [thread:$0]  %s226_s0, 256, %s15_s10, [#allocation5], %s174_s19, %s174_s19, %s175_s20  }
  0x12   :  { %169 = dma.done.wait [#allocation5], 256  }
  0x13   :  { %170 = vsyncadd [#allocation5], 4294967040  ;;  %vm32_vm0 = vcmask 1024   ;;  %v176_v0 = vmov 0.0   ;;  %v34_v1 = vld [vmem:[%s227_s1] sm:$0x3]  ;;  %v39_v4 = vlaneseq }
  0x14   :  { %33 = vst.msk [vmem:[#allocation3] sm:$0x3] %vm32_vm0, %v176_v0  ;;  %vm79_vm1 = vcmask 58368   ;;  %v35_v2 = vcvt.s32.f32 %v34_v1  ;;  %v177_v9 = vmov 0   ;;  %v37_v11 = vld [vmem:[#allocation4 + $0x8] sm:$0xff]  ;;  %vm55_vm2 = vcmask 261120  }
  0x15   :  { %v40_v5 = vshrl.u32 %v39_v4, 7  ;;  %121 = vset.pattern.permute.xlu1 %v177_v9  ;;  %122 = vset.pattern.permute.xlu0 %v177_v9  ;;  %vm30_vm3 = vcmask 254976   ;;  %v36_v20 = vld [vmem:[#allocation4] sm:$0xff]  ;;  %vm72_vm4 = vcmask 1041409   ;;  %s178_s0 = smov [#allocation7]  }
  0x16   :  { %v80_v3 = vsel %vm79_vm1, %v35_v2, 0.0  ;;  %31 = vst.msk [vmem:[#allocation2] sm:$0x3] %vm30_vm3, %v176_v0  ;;  %s106_s1 = sshll.u32 %s178_s0, 4  ;;  %s107_s1 = int_to_ptr.vmem [resolvable:$true] %s106_s1 }
  0x17   :  { %81 = vadd.xlane.f32.xlu0 %v80_v3  ;;  %v48_v6 = vsub.s32 1, %v40_v5  ;;  %v41_v8 = vsub.s32 0, %v40_v5  ;;  %s147_s25 = scalar_lea.vmem %s107_s1, 32  ;;  %p152_p9 = scmp.lt.s32.totalorder %s107_s1, %s107_s1 }
  0x18   :  { %p148_p8 = scmp.ne.s32.totalorder %s107_s1, %s147_s25  ;;  %p153_p10 = scmp.lt.s32.totalorder %s147_s25, %s147_s25 }
  0x19   :  { %v49_v7 = vrot.slane %v35_v2, %v48_v6  ;;  %v42_v10 = vrot.slane %v35_v2, %v41_v8 }
  0x1a   :  { %p154_p11 = por %p153_p10, %p152_p9 }
  0x1b   :  { %51 = vbcast.lane.b32.xlu1 %v49_v7, 256  ;;  %v78_v16 = vld [vmem:[#allocation3] sm:$0x3] }
  0x1c   :  { %p155_p12 = pnand %p154_p11, %p148_p8 }
  0x1d   :  { %v38_v36 = vld [vmem:[#allocation2] sm:$0x3] }
  0x2d   :  { %44 = vbcast.lane.b32.xlu0 %v42_v10, 256 }
  0x8d   :  { %v52_v12 = vpop.permute.xlu1 %51 }
  0x8e   :  { %v54_v13 = vmul.f32 %v52_v12, %v37_v11 }
  0x90   :  { %v63_v14 = vsel %vm55_vm2, %v54_v13, 0.0 }
  0x91   :  { %v64_v15 = vrot.slane %v63_v14, 4 }
  0x93   :  { %v65_v18 = vadd.f32 %v64_v15, %v63_v14 }
  0x95   :  { %v66_v21 = vrot.slane %v65_v18, 2 }
  0x97   :  { %v67_v25 = vadd.f32 %v66_v21, %v65_v18 }
  0x99   :  { %v68_v30 = vrot.slane %v67_v25, 1 }
  0x9b   :  { %v69_v33 = vadd.f32 %v68_v30, %v67_v25 }
  0xa4   :  { %v82_v17 = vpop.xlane.xlu0 %81 }
  0xa5   :  { %v83_v19 = vadd.f32 %v82_v17, %v78_v16 }
  0xa7   :  { %85 = vst.msk [vmem:[#allocation3] sm:$0x3] %vm32_vm0, %v83_v19 }
  0xa8   :  { %v45_v22 = vpop.permute.xlu0 %44 }
  0xa9   :  { %v53_v23 = vmul.f32 %v45_v22, %v36_v20 }
  0xab   :  { %v56_v24 = vsel %vm55_vm2, %v53_v23, 0.0 }
  0xac   :  { %v57_v26 = vrot.slane %v56_v24, 4 }
  0xae   :  { %v89_v27 = vld [vmem:[#allocation3] sm:$0x3]  ;;  %v58_v28 = vadd.f32 %v57_v26, %v56_v24 }
  0xaf   :  { %v90_v29 = vmax.f32 %v89_v27, 1e-09 }
  0xb0   :  { %v59_v31 = vrot.slane %v58_v28, 2 }
  0xb1   :  { %94 = vperm.xlu1 %121, %v90_v29  }
  0xb2   :  { %v60_v32 = vadd.f32 %v59_v31, %v58_v28 }
  0xb4   :  { %v61_v34 = vrot.slane %v60_v32, 1 }
  0xb6   :  { %v62_v35 = vadd.f32 %v61_v34, %v60_v32 }
  0xb8   :  { %v73_v37 = vsel %vm72_vm4, %v69_v33, %v62_v35 }
  0xb9   :  { %v75_v38 = vadd.f32 %v73_v37, %v38_v36 }
  0xbb   :  { %77 = vst.msk [vmem:[#allocation2] sm:$0x3] %vm30_vm3, %v75_v38 }
  0xc2   :  { %v91_v41 = vld [vmem:[#allocation2] sm:$0x3] }
 0x130   :  { %v95_v39 = vpop.permute.xlu1 %94 }
 0x131   :  { %123 = vrcp.f32 %v95_v39 }
 0x13b   :  { %v124_v40 = vpop.eup %123 }
 0x13c   :  { %v98_v42 = vmul.f32 %v124_v40, %v91_v41 }
 0x13e   :  { %99 = vst.msk [vmem:[#allocation7] sm:$0x3] %vm30_vm3, %v98_v42 }
 0x13f   :  { %158 = shalt.err (!%p155_p12)
}
 0x140   :  { %s159_s28 = scalar_lea.hbm %s228_s2, 32 }
 0x141   :  { %p160_p13 = scmp.ne.s32.totalorder %s228_s2, %s159_s28  ;;  %p163_p0 = scmp.lt.u32.totalorder %s159_s28, %s228_s2 }
 0x143   :  { %p165_p1 = pnand %p163_p0, %p160_p13 }
 0x145   :  { %168 = shalt.err (!%p165_p1)
}
 0x146   :  { %109 = dma.vmem_to_hbm [thread:$0]  %s107_s1, 32, %s228_s2, [#allocation6]  }
 0x147   :  { %171 = dma.done.wait [#allocation6], 32  }
 0x148   :  { %172 = vsyncadd [#allocation6], 4294967264 }
 0x149   :  { %113 = vsyncpa [#allocation5], 1 }
 0x14a   :  { %114 = vsyncpa [#allocation6], 1 }

</bundles_post_ra>
